<compile_context>
chip_gen: v7x
topology: tpu7x:2x2x1
jax: 0.10.0
libtpu: 0.0.40
codegen_flags: <defaults>
</compile_context>

<pallas_src>
import jax
import jax.numpy as jnp
from jax.experimental import pallas as pl
from jax.experimental.pallas import tpu as pltpu

_LANES = 128
_SUBLANES = 8
_ROW_ALIGN = 32                        # covers (8,128) f32, (16,128) bf16, (32,128) int8
_ALIGN_ELEMS = _ROW_ALIGN * _LANES     # flat length padded to a multiple of this (4096)
_CHUNK_ROWS = 1024                     # inner accumulate chunk (<= ~1.5 MiB f32 live)
_TARGET_DB_BYTES = 32 * 1024 * 1024    # target double-buffered footprint of both inputs
_MAX_BLOCK_ROWS = 32 * 1024


def _tensorcores_per_device() -> int:
    """Best-effort TensorCore-per-device count (1 on v5e/v6e, 2 on v7x)."""
    try:
        info = pltpu.get_tpu_info()
        for name in ("num_cores", "core_count", "num_tensorcores",
                     "tensorcores_per_chip", "cores_per_chip", "num_cores_per_chip"):
            try:
                v = int(getattr(info, name))
            except (AttributeError, TypeError, ValueError):
                continue
            if 1 <= v <= 16:
                return v
    except Exception:
        pass
    try:
        dev = jax.devices()[0]
        for name in ("num_cores", "core_count"):
            try:
                v = int(getattr(dev, name))
            except (AttributeError, TypeError, ValueError):
                continue
            if 1 <= v <= 16:
                return v
        if "v7" in str(getattr(dev, "device_kind", "")).lower():
            return 2
    except Exception:
        pass
    return 1


def _make_dice_kernel(block_rows: int, chunk_rows: int, blocks_per_slice: int):
    assert block_rows % chunk_rows == 0
    assert chunk_rows % _SUBLANES == 0
    n_chunks = block_rows // chunk_rows
    sub = chunk_rows // _SUBLANES

    def dice_kernel(valid_rows_ref, x_ref, y_ref, out_ref,
                    acc_xy_ref, acc_x_ref, acc_y_ref):
        p = pl.program_id(0)   # TensorCore shard (core-parallel on v7x)
        j = pl.program_id(1)   # streaming / reduction axis

        @pl.when(j == 0)
        def _init():
            acc_xy_ref[...] = jnp.zeros_like(acc_xy_ref)
            acc_x_ref[...] = jnp.zeros_like(acc_x_ref)
            acc_y_ref[...] = jnp.zeros_like(acc_y_ref)

        # Scalar bookkeeping: how many rows of this block are real data.
        # (int32 is fine: the wrapper asserts total elements < 2**31.)
        row0 = (p * blocks_per_slice + j) * block_rows
        rows_left = valid_rows_ref[0] - row0

        def fold(v):
            # Rows -> vreg-shaped (8,128) partial; pure VPU adds that hide
            # under the DMA. Cross-lane reduce happens once in the epilogue.
            return jnp.sum(v.reshape(sub, _SUBLANES, _LANES), axis=0)

        def accumulate(r0, limit):
            x = x_ref[pl.ds(r0, chunk_rows), :].astype(jnp.float32)
            y = y_ref[pl.ds(r0, chunk_rows), :].astype(jnp.float32)
            if limit is not None:   # masked (ragged / clamped-duplicate) path only
                valid = jax.lax.broadcasted_iota(
                    jnp.int32, (chunk_rows, _LANES), 0) < limit
                x = jnp.where(valid, x, 0.0)
                y = jnp.where(valid, y, 0.0)
            acc_xy_ref[...] += fold(x * y)
            acc_x_ref[...] += fold(x)
            acc_y_ref[...] += fold(y)

        # Fast path: block is fully inside the data -> no masking at all.
        @pl.when(rows_left >= block_rows)
        def _fast():
            if n_chunks == 1:
                accumulate(0, None)
            else:
                def body(c, carry):
                    accumulate(pl.multiple_of(c * chunk_rows, chunk_rows), None)
                    return carry
                jax.lax.fori_loop(0, n_chunks, body, 0)

        # Slow path: ragged last block (or fully-clamped duplicate block).
        @pl.when(rows_left < block_rows)
        def _masked():
            if n_chunks == 1:
                accumulate(0, rows_left)
            else:
                def body(c, carry):
                    start = c * chunk_rows
                    accumulate(pl.multiple_of(start, chunk_rows),
                               rows_left - start)
                    return carry
                jax.lax.fori_loop(0, n_chunks, body, 0)

        @pl.when(j == pl.num_programs(1) - 1)
        def _epilogue():
            out_ref[0, 0] = jnp.sum(acc_xy_ref[...])   # intersection
            out_ref[0, 1] = jnp.sum(acc_x_ref[...])    # sum(inputs)
            out_ref[0, 2] = jnp.sum(acc_y_ref[...])    # sum(targets)

    return dice_kernel


def dice_loss(inputs: jax.Array, targets: jax.Array, smooth: float = 1.0,
              *, _block_rows=None, _chunk_rows=None, _num_slices=None) -> jax.Array:
    """Pallas TPU implementation of DiceLoss.forward. Returns a scalar f32."""
    x = inputs.reshape(-1)
    y = targets.reshape(-1)
    if x.dtype == jnp.bool_:
        x = x.astype(jnp.int8)
    if y.dtype == jnp.bool_:
        y = y.astype(jnp.int8)
    n = x.shape[0]
    if n >= 2**31:
        raise ValueError("dice_loss: int32 row bookkeeping requires < 2**31 elements")

    # Align the flat length to one (32,128) tile (covers f32/bf16/int8 packing).
    # For typical NCHW shapes this is a no-op; otherwise a tiny sum-neutral pad.
    n_al = -(-n // _ALIGN_ELEMS) * _ALIGN_ELEMS
    if n_al != n:
        x = jnp.pad(x, (0, n_al - n))
        y = jnp.pad(y, (0, n_al - n))

    rows = n_al // _LANES                       # multiple of 32
    x2 = x.reshape(rows, _LANES)
    y2 = y.reshape(rows, _LANES)

    # --- block sizing (by dtype, targeting ~32 MiB double-buffered) ---------
    if _block_rows is not None:
        block_rows = int(_block_rows)
        chunk_rows = int(_chunk_rows) if _chunk_rows is not None else min(block_rows, _CHUNK_ROWS)
    elif rows <= _CHUNK_ROWS:
        block_rows = rows
        chunk_rows = rows
    else:
        bytes_per_row = _LANES * (x2.dtype.itemsize + y2.dtype.itemsize)
        target = _TARGET_DB_BYTES // (2 * bytes_per_row)        # 2 = double buffering
        target = max(_CHUNK_ROWS, min(target, _MAX_BLOCK_ROWS))
        target = (target // _CHUNK_ROWS) * _CHUNK_ROWS
        rows_rounded = -(-rows // _CHUNK_ROWS) * _CHUNK_ROWS
        block_rows = min(target, rows_rounded)
        chunk_rows = _CHUNK_ROWS
    assert block_rows % chunk_rows == 0 and block_rows % _SUBLANES == 0

    num_blocks = -(-rows // block_rows)
    detected_cores = _tensorcores_per_device()
    cores = int(_num_slices) if _num_slices is not None else detected_cores
    num_slices = max(1, min(cores, num_blocks))
    blocks_per_slice = -(-num_blocks // num_slices)

    # VMEM limit: ~1.3x the real double-buffered footprint + margin for the
    # in-chunk f32 intermediates and the (8,128) accumulators.
    db_bytes = 2 * block_rows * _LANES * (x2.dtype.itemsize + y2.dtype.itemsize)
    vmem_limit = int(db_bytes * 1.3) + 4 * 1024 * 1024
    vmem_limit = min(max(vmem_limit, 8 * 1024 * 1024), 56 * 1024 * 1024)

    cost = pl.CostEstimate(
        flops=3 * rows * _LANES,
        transcendentals=0,
        bytes_accessed=int(rows * _LANES * (x2.dtype.itemsize + y2.dtype.itemsize)
                           + num_slices * 3 * 4),
    )

    def in_map(p, j, _valid_rows_ref):
        # Clamp so every block index stays in range; clamped (duplicate) blocks
        # are fully masked in-kernel via the valid-row count.
        b = jnp.minimum(p * blocks_per_slice + j, num_blocks - 1)
        return (b, 0)

    kernel = _make_dice_kernel(block_rows, chunk_rows, blocks_per_slice)
    valid_rows = jnp.array([rows], dtype=jnp.int32)

    def run(core_parallel: bool):
        dims = ((pltpu.CORE_PARALLEL, pltpu.ARBITRARY) if core_parallel
                else ("parallel", "arbitrary"))
        return pl.pallas_call(
            kernel,
            out_shape=jax.ShapeDtypeStruct((num_slices, 3), jnp.float32),
            grid_spec=pltpu.PrefetchScalarGridSpec(
                num_scalar_prefetch=1,
                grid=(num_slices, blocks_per_slice),
                in_specs=[
                    pl.BlockSpec((block_rows, _LANES), in_map),
                    pl.BlockSpec((block_rows, _LANES), in_map),
                ],
                out_specs=pl.BlockSpec(
                    (1, 3), lambda p, j, _vr: (p, 0), memory_space=pltpu.SMEM),
                scratch_shapes=[
                    pltpu.VMEM((_SUBLANES, _LANES), jnp.float32),
                    pltpu.VMEM((_SUBLANES, _LANES), jnp.float32),
                    pltpu.VMEM((_SUBLANES, _LANES), jnp.float32),
                ],
            ),
            compiler_params=pltpu.CompilerParams(
                dimension_semantics=dims,
                vmem_limit_bytes=vmem_limit,
            ),
            cost_estimate=cost,
        )(valid_rows, x2, y2)

    want_core_parallel = (num_slices > 1) and (detected_cores > 1)
    if want_core_parallel:
        try:
            partials = run(True)
        except Exception:
            partials = run(False)   # fall back to the proven plain-parallel path
    else:
        partials = run(False)

    # Tiny combine over (num_slices, 3) per-core partials + dice formula.
    intersection = jnp.sum(partials[:, 0])
    total = jnp.sum(partials[:, 1]) + jnp.sum(partials[:, 2])
    dice = (2.0 * intersection + smooth) / (total + smooth)
    return (1.0 - dice).astype(jnp.float32)


def dice_loss_ref(inputs, targets, smooth: float = 1.0):
    x = inputs.reshape(-1).astype(jnp.float32)
    y = targets.reshape(-1).astype(jnp.float32)
    inter = jnp.sum(x * y)
    total = jnp.sum(x) + jnp.sum(y)
    return 1.0 - (2.0 * inter + smooth) / (total + smooth)


if __name__ == "__main__":
    key = jax.random.PRNGKey(0)
    k1, k2, k3, k4, k5, k6 = jax.random.split(key, 6)

    # 1) Primary: small NCHW segmentation-style shapes, f32 (matches the spec).
    inputs = jax.nn.sigmoid(jax.random.normal(k1, (2, 4, 16, 16), jnp.float32))
    targets = (jax.random.uniform(k2, (2, 4, 16, 16)) > 0.5).astype(jnp.float32)
    loss = dice_loss(inputs, targets, smooth=1.0)
    jax.block_until_ready(loss)
    ref = dice_loss_ref(inputs, targets, smooth=1.0)
    assert jnp.allclose(loss, ref, atol=1e-5, rtol=1e-5), (loss, ref)

    # 2) Narrow dtypes end-to-end (bf16 probabilities, int8 masks) + pad path.
    x_bf16 = jax.nn.sigmoid(
        jax.random.normal(k3, (2, 3, 17, 19), jnp.float32)).astype(jnp.bfloat16)
    y_i8 = (jax.random.uniform(k4, (2, 3, 17, 19)) > 0.5).astype(jnp.int8)
    loss2 = dice_loss(x_bf16, y_i8, smooth=1.0)
    jax.block_until_ready(loss2)
    ref2 = dice_loss_ref(x_bf16, y_i8, smooth=1.0)
    assert jnp.allclose(loss2, ref2, atol=1e-4, rtol=1e-4), (loss2, ref2)

    # 3) Multi-block + ragged last block + clamped duplicate block (forced tiny
    #    tiles so the shapes stay small) to lock in the masking logic.
    x3 = jax.nn.sigmoid(jax.random.normal(k5, (1, 1, 160, 128), jnp.float32))
    y3 = (jax.random.uniform(k6, (1, 1, 160, 128)) > 0.5).astype(jnp.float32)
    loss3 = dice_loss(x3, y3, smooth=1.0,
                      _block_rows=64, _chunk_rows=32, _num_slices=2)
    jax.block_until_ready(loss3)
    ref3 = dice_loss_ref(x3, y3, smooth=1.0)
    assert jnp.allclose(loss3, ref3, atol=1e-5, rtol=1e-5), (loss3, ref3)

    print("KERNEL_OK")
</pallas_src>

<mosaic_0001>
module attributes {stable_mosaic.version = 11 : i64} {
  func.func @dice_kernel(%arg0: i32, %arg1: i32, %arg2: memref<1xi32, #tpu.memory_space<smem>>, %arg3: memref<32x128xf32, #tpu.memory_space<vmem>>, %arg4: memref<32x128xf32, #tpu.memory_space<vmem>>, %arg5: memref<1x3xf32, #tpu.memory_space<smem>>, %arg6: memref<8x128xf32, #tpu.memory_space<vmem>>, %arg7: memref<8x128xf32, #tpu.memory_space<vmem>>, %arg8: memref<8x128xf32, #tpu.memory_space<vmem>>) attributes {dimension_semantics = [#tpu.dimension_semantics<parallel>, #tpu.dimension_semantics<arbitrary>], iteration_bounds = array<i64: 1, 1>, scalar_prefetch = 1 : i64, scratch_operands = 3 : i64, tpu.core_type = #tpu.core_type<tc>, window_params = [{transform_indices = @transform_0, window_bounds = array<i64: 32, 128>}, {transform_indices = @transform_1, window_bounds = array<i64: 32, 128>}, {transform_indices = @transform_2, window_bounds = array<i64: 1, 3>}]} {
    %c0_i32 = arith.constant 0 : i32
    %0 = arith.cmpi eq, %arg1, %c0_i32 : i32
    %1 = arith.extui %0 : i1 to i32
    %c0_i32_0 = arith.constant 0 : i32
    %2 = arith.cmpi ne, %1, %c0_i32_0 : i32
    scf.if %2 {
      %cst = arith.constant 0.000000e+00 : f32
      %17 = vector.broadcast %cst : f32 to vector<8x128xf32>
      %c0_7 = arith.constant 0 : index
      %c0_8 = arith.constant 0 : index
      %18 = vector.load %arg6[%c0_7, %c0_8] : memref<8x128xf32, #tpu.memory_space<vmem>>, vector<8x128xf32>
      tpu.vector_store %arg6[%c0_7, %c0_8], %17 {strides = array<i32>} : memref<8x128xf32, #tpu.memory_space<vmem>>, vector<8x128xf32>,
      %cst_9 = arith.constant 0.000000e+00 : f32
      %19 = vector.broadcast %cst_9 : f32 to vector<8x128xf32>
      %c0_10 = arith.constant 0 : index
      %c0_11 = arith.constant 0 : index
      %20 = vector.load %arg7[%c0_10, %c0_11] : memref<8x128xf32, #tpu.memory_space<vmem>>, vector<8x128xf32>
      tpu.vector_store %arg7[%c0_10, %c0_11], %19 {strides = array<i32>} : memref<8x128xf32, #tpu.memory_space<vmem>>, vector<8x128xf32>,
      %cst_12 = arith.constant 0.000000e+00 : f32
      %21 = vector.broadcast %cst_12 : f32 to vector<8x128xf32>
      %c0_13 = arith.constant 0 : index
      %c0_14 = arith.constant 0 : index
      %22 = vector.load %arg8[%c0_13, %c0_14] : memref<8x128xf32, #tpu.memory_space<vmem>>, vector<8x128xf32>
      tpu.vector_store %arg8[%c0_13, %c0_14], %21 {strides = array<i32>} : memref<8x128xf32, #tpu.memory_space<vmem>>, vector<8x128xf32>,
    } else {
    }
    %c1_i32 = arith.constant 1 : i32
    %3 = arith.muli %arg0, %c1_i32 : i32
    %4 = arith.addi %3, %arg1 : i32
    %c32_i32 = arith.constant 32 : i32
    %5 = arith.muli %4, %c32_i32 : i32
    %c0 = arith.constant 0 : index
    %6 = memref.load %arg2[%c0] : memref<1xi32, #tpu.memory_space<smem>>
    %7 = arith.subi %6, %5 : i32
    %c32_i32_1 = arith.constant 32 : i32
    %8 = arith.cmpi sge, %7, %c32_i32_1 : i32
    %9 = arith.extui %8 : i1 to i32
    %c0_i32_2 = arith.constant 0 : i32
    %10 = arith.cmpi ne, %9, %c0_i32_2 : i32
    scf.if %10 {
      %c0_7 = arith.constant 0 : index
      %c0_8 = arith.constant 0 : index
      %17 = vector.load %arg3[%c0_7, %c0_8] : memref<32x128xf32, #tpu.memory_space<vmem>>, vector<32x128xf32>
      %c0_9 = arith.constant 0 : index
      %c0_10 = arith.constant 0 : index
      %18 = vector.load %arg4[%c0_9, %c0_10] : memref<32x128xf32, #tpu.memory_space<vmem>>, vector<32x128xf32>
      %c0_11 = arith.constant 0 : index
      %c0_12 = arith.constant 0 : index
      %19 = vector.load %arg6[%c0_11, %c0_12] : memref<8x128xf32, #tpu.memory_space<vmem>>, vector<8x128xf32>
      %20 = arith.mulf %17, %18 : vector<32x128xf32>
      %21 = vector.shape_cast %20 : vector<32x128xf32> to vector<4x8x128xf32>
      %cst = arith.constant dense<0.000000e+00> : vector<8x128xf32>
      %22 = vector.multi_reduction <add>, %21, %cst [0] : vector<4x8x128xf32> to vector<8x128xf32>
      %23 = arith.addf %19, %22 : vector<8x128xf32>
      %c0_13 = arith.constant 0 : index
      %c0_14 = arith.constant 0 : index
      %24 = vector.load %arg6[%c0_13, %c0_14] : memref<8x128xf32, #tpu.memory_space<vmem>>, vector<8x128xf32>
      tpu.vector_store %arg6[%c0_13, %c0_14], %23 {strides = array<i32>} : memref<8x128xf32, #tpu.memory_space<vmem>>, vector<8x128xf32>,
      %c0_15 = arith.constant 0 : index
      %c0_16 = arith.constant 0 : index
      %25 = vector.load %arg7[%c0_15, %c0_16] : memref<8x128xf32, #tpu.memory_space<vmem>>, vector<8x128xf32>
      %26 = vector.shape_cast %17 : vector<32x128xf32> to vector<4x8x128xf32>
      %cst_17 = arith.constant dense<0.000000e+00> : vector<8x128xf32>
      %27 = vector.multi_reduction <add>, %26, %cst_17 [0] : vector<4x8x128xf32> to vector<8x128xf32>
      %28 = arith.addf %25, %27 : vector<8x128xf32>
      %c0_18 = arith.constant 0 : index
      %c0_19 = arith.constant 0 : index
      %29 = vector.load %arg7[%c0_18, %c0_19] : memref<8x128xf32, #tpu.memory_space<vmem>>, vector<8x128xf32>
      tpu.vector_store %arg7[%c0_18, %c0_19], %28 {strides = array<i32>} : memref<8x128xf32, #tpu.memory_space<vmem>>, vector<8x128xf32>,
      %c0_20 = arith.constant 0 : index
      %c0_21 = arith.constant 0 : index
      %30 = vector.load %arg8[%c0_20, %c0_21] : memref<8x128xf32, #tpu.memory_space<vmem>>, vector<8x128xf32>
      %31 = vector.shape_cast %18 : vector<32x128xf32> to vector<4x8x128xf32>
      %cst_22 = arith.constant dense<0.000000e+00> : vector<8x128xf32>
      %32 = vector.multi_reduction <add>, %31, %cst_22 [0] : vector<4x8x128xf32> to vector<8x128xf32>
      %33 = arith.addf %30, %32 : vector<8x128xf32>
      %c0_23 = arith.constant 0 : index
      %c0_24 = arith.constant 0 : index
      %34 = vector.load %arg8[%c0_23, %c0_24] : memref<8x128xf32, #tpu.memory_space<vmem>>, vector<8x128xf32>
      tpu.vector_store %arg8[%c0_23, %c0_24], %33 {strides = array<i32>} : memref<8x128xf32, #tpu.memory_space<vmem>>, vector<8x128xf32>,
    } else {
    }
    %c32_i32_3 = arith.constant 32 : i32
    %11 = arith.cmpi slt, %7, %c32_i32_3 : i32
    %12 = arith.extui %11 : i1 to i32
    %c0_i32_4 = arith.constant 0 : i32
    %13 = arith.cmpi ne, %12, %c0_i32_4 : i32
    scf.if %13 {
      %c0_7 = arith.constant 0 : index
      %c0_8 = arith.constant 0 : index
      %17 = vector.load %arg3[%c0_7, %c0_8] : memref<32x128xf32, #tpu.memory_space<vmem>>, vector<32x128xf32>
      %c0_9 = arith.constant 0 : index
      %c0_10 = arith.constant 0 : index
      %18 = vector.load %arg4[%c0_9, %c0_10] : memref<32x128xf32, #tpu.memory_space<vmem>>, vector<32x128xf32>
      %19 = tpu.iota {dimensions = array<i32: 0>} : vector<32x128xi32>
      %20 = vector.broadcast %7 : i32 to vector<32x128xi32>
      %21 = arith.cmpi slt, %19, %20 : vector<32x128xi32>
      %cst = arith.constant 0.000000e+00 : f32
      %22 = vector.broadcast %cst : f32 to vector<32x128xf32>
      %23 = arith.select %21, %17, %22 : vector<32x128xi1>, vector<32x128xf32>
      %cst_11 = arith.constant 0.000000e+00 : f32
      %24 = vector.broadcast %cst_11 : f32 to vector<32x128xf32>
      %25 = arith.select %21, %18, %24 : vector<32x128xi1>, vector<32x128xf32>
      %c0_12 = arith.constant 0 : index
      %c0_13 = arith.constant 0 : index
      %26 = vector.load %arg6[%c0_12, %c0_13] : memref<8x128xf32, #tpu.memory_space<vmem>>, vector<8x128xf32>
      %27 = arith.mulf %23, %25 : vector<32x128xf32>
      %28 = vector.shape_cast %27 : vector<32x128xf32> to vector<4x8x128xf32>
      %cst_14 = arith.constant dense<0.000000e+00> : vector<8x128xf32>
      %29 = vector.multi_reduction <add>, %28, %cst_14 [0] : vector<4x8x128xf32> to vector<8x128xf32>
      %30 = arith.addf %26, %29 : vector<8x128xf32>
      %c0_15 = arith.constant 0 : index
      %c0_16 = arith.constant 0 : index
      %31 = vector.load %arg6[%c0_15, %c0_16] : memref<8x128xf32, #tpu.memory_space<vmem>>, vector<8x128xf32>
      tpu.vector_store %arg6[%c0_15, %c0_16], %30 {strides = array<i32>} : memref<8x128xf32, #tpu.memory_space<vmem>>, vector<8x128xf32>,
      %c0_17 = arith.constant 0 : index
      %c0_18 = arith.constant 0 : index
      %32 = vector.load %arg7[%c0_17, %c0_18] : memref<8x128xf32, #tpu.memory_space<vmem>>, vector<8x128xf32>
      %33 = vector.shape_cast %23 : vector<32x128xf32> to vector<4x8x128xf32>
      %cst_19 = arith.constant dense<0.000000e+00> : vector<8x128xf32>
      %34 = vector.multi_reduction <add>, %33, %cst_19 [0] : vector<4x8x128xf32> to vector<8x128xf32>
      %35 = arith.addf %32, %34 : vector<8x128xf32>
      %c0_20 = arith.constant 0 : index
      %c0_21 = arith.constant 0 : index
      %36 = vector.load %arg7[%c0_20, %c0_21] : memref<8x128xf32, #tpu.memory_space<vmem>>, vector<8x128xf32>
      tpu.vector_store %arg7[%c0_20, %c0_21], %35 {strides = array<i32>} : memref<8x128xf32, #tpu.memory_space<vmem>>, vector<8x128xf32>,
      %c0_22 = arith.constant 0 : index
      %c0_23 = arith.constant 0 : index
      %37 = vector.load %arg8[%c0_22, %c0_23] : memref<8x128xf32, #tpu.memory_space<vmem>>, vector<8x128xf32>
      %38 = vector.shape_cast %25 : vector<32x128xf32> to vector<4x8x128xf32>
      %cst_24 = arith.constant dense<0.000000e+00> : vector<8x128xf32>
      %39 = vector.multi_reduction <add>, %38, %cst_24 [0] : vector<4x8x128xf32> to vector<8x128xf32>
      %40 = arith.addf %37, %39 : vector<8x128xf32>
      %c0_25 = arith.constant 0 : index
      %c0_26 = arith.constant 0 : index
      %41 = vector.load %arg8[%c0_25, %c0_26] : memref<8x128xf32, #tpu.memory_space<vmem>>, vector<8x128xf32>
      tpu.vector_store %arg8[%c0_25, %c0_26], %40 {strides = array<i32>} : memref<8x128xf32, #tpu.memory_space<vmem>>, vector<8x128xf32>,
    } else {
    }
    %c0_i32_5 = arith.constant 0 : i32
    %14 = arith.cmpi eq, %arg1, %c0_i32_5 : i32
    %15 = arith.extui %14 : i1 to i32
    %c0_i32_6 = arith.constant 0 : i32
    %16 = arith.cmpi ne, %15, %c0_i32_6 : i32
    scf.if %16 {
      %c0_7 = arith.constant 0 : index
      %c0_8 = arith.constant 0 : index
      %17 = vector.load %arg6[%c0_7, %c0_8] : memref<8x128xf32, #tpu.memory_space<vmem>>, vector<8x128xf32>
      %18 = vector.shape_cast %17 : vector<8x128xf32> to vector<1x8x128xf32>
      %cst = arith.constant dense<0.000000e+00> : vector<1xf32>
      %19 = vector.multi_reduction <add>, %18, %cst [1, 2] : vector<1x8x128xf32> to vector<1xf32>
      %20 = vector.shape_cast %19 : vector<1xf32> to vector<1x1x1xf32>
      %21 = vector.extract %20[0, 0, 0] : f32 from vector<1x1x1xf32>
      %c0_9 = arith.constant 0 : index
      %c0_10 = arith.constant 0 : index
      %22 = memref.load %arg5[%c0_9, %c0_10] : memref<1x3xf32, #tpu.memory_space<smem>>
      memref.store %21, %arg5[%c0_9, %c0_10] : memref<1x3xf32, #tpu.memory_space<smem>>
      %c0_11 = arith.constant 0 : index
      %c0_12 = arith.constant 0 : index
      %23 = vector.load %arg7[%c0_11, %c0_12] : memref<8x128xf32, #tpu.memory_space<vmem>>, vector<8x128xf32>
      %24 = vector.shape_cast %23 : vector<8x128xf32> to vector<1x8x128xf32>
      %cst_13 = arith.constant dense<0.000000e+00> : vector<1xf32>
      %25 = vector.multi_reduction <add>, %24, %cst_13 [1, 2] : vector<1x8x128xf32> to vector<1xf32>
      %26 = vector.shape_cast %25 : vector<1xf32> to vector<1x1x1xf32>
      %27 = vector.extract %26[0, 0, 0] : f32 from vector<1x1x1xf32>
      %c0_14 = arith.constant 0 : index
      %c1 = arith.constant 1 : index
      %28 = memref.load %arg5[%c0_14, %c1] : memref<1x3xf32, #tpu.memory_space<smem>>
      memref.store %27, %arg5[%c0_14, %c1] : memref<1x3xf32, #tpu.memory_space<smem>>
      %c0_15 = arith.constant 0 : index
      %c0_16 = arith.constant 0 : index
      %29 = vector.load %arg8[%c0_15, %c0_16] : memref<8x128xf32, #tpu.memory_space<vmem>>, vector<8x128xf32>
      %30 = vector.shape_cast %29 : vector<8x128xf32> to vector<1x8x128xf32>
      %cst_17 = arith.constant dense<0.000000e+00> : vector<1xf32>
      %31 = vector.multi_reduction <add>, %30, %cst_17 [1, 2] : vector<1x8x128xf32> to vector<1xf32>
      %32 = vector.shape_cast %31 : vector<1xf32> to vector<1x1x1xf32>
      %33 = vector.extract %32[0, 0, 0] : f32 from vector<1x1x1xf32>
      %c0_18 = arith.constant 0 : index
      %c2 = arith.constant 2 : index
      %34 = memref.load %arg5[%c0_18, %c2] : memref<1x3xf32, #tpu.memory_space<smem>>
      memref.store %33, %arg5[%c0_18, %c2] : memref<1x3xf32, #tpu.memory_space<smem>>
    } else {
    }
    return
  }
  func.func @transform_0(%arg0: i32, %arg1: i32, %arg2: memref<1xi32, #tpu.memory_space<smem>>) -> (i32, i32) {
    %c1_i32 = arith.constant 1 : i32
    %0 = arith.muli %arg0, %c1_i32 : i32
    %1 = arith.addi %0, %arg1 : i32
    %c0_i32 = arith.constant 0 : i32
    %2 = arith.minsi %1, %c0_i32 : i32
    %c0_i32_0 = arith.constant 0 : i32
    %c0_i32_1 = arith.constant 0 : i32
    return %2, %c0_i32_0 : i32, i32
  }
  func.func @transform_1(%arg0: i32, %arg1: i32, %arg2: memref<1xi32, #tpu.memory_space<smem>>) -> (i32, i32) {
    %c1_i32 = arith.constant 1 : i32
    %0 = arith.muli %arg0, %c1_i32 : i32
    %1 = arith.addi %0, %arg1 : i32
    %c0_i32 = arith.constant 0 : i32
    %2 = arith.minsi %1, %c0_i32 : i32
    %c0_i32_0 = arith.constant 0 : i32
    %c0_i32_1 = arith.constant 0 : i32
    return %2, %c0_i32_0 : i32, i32
  }
  func.func @transform_2(%arg0: i32, %arg1: i32, %arg2: memref<1xi32, #tpu.memory_space<smem>>) -> (i32, i32) {
    %c0_i32 = arith.constant 0 : i32
    %c0_i32_0 = arith.constant 0 : i32
    return %arg0, %c0_i32 : i32, i32
  }
}

</mosaic_0001>

<bundles_post_ra>
// kernel: tpu_custom_call.1
= control target key start
LH: loop header
LB: loop body
LE: loop exit
PB: predicated region body
PF: predicated region fallthrough
CT: control target
= control target key end

     0   :  { %9 = vsyncpa [#allocation8], 0  ;;  %s362_s0 = inlined_call_operand.<no memory space> [shape: s32[1], index: 0, kind: input, shape index: {}]   ;;  %s363_s1 = inlined_call_operand.hbm [shape: f32[32,128], index: 1, kind: input, shape index: {}]   ;;  %s364_s2 = inlined_call_operand.hbm [shape: f32[32,128], index: 2, kind: input, shape index: {}]   ;;  %s365_s3 = inlined_call_operand.hbm [shape: f32[1,3], index: 3, kind: output, shape index: {}]  }
   0x1   :  { %10 = vsyncpa [#allocation11], 0 }
   0x2   :  { %11 = vsyncpa [#allocation9], 0  ;;  %s291_s12 = smov [#allocation7]   ;;  %s231_s16 = scalar_lea.hbm %s363_s1, 512 }
   0x3   :  { %s23_s13 = sshll.u32 %s291_s12, 4  ;;  %p232_p0 = scmp.ne.s32.totalorder %s363_s1, %s231_s16  ;;  %s24_s13 = int_to_ptr.vmem [resolvable:$true] %s23_s13 }
   0x4   :  { %p235_p1 = scmp.lt.u32.totalorder %s231_s16, %s363_s1 }
   0x6   :  { %p237_p2 = pnand %p235_p1, %p232_p0 }
   0x8   :  { %240 = shalt.err (!%p237_p2)
}
   0x9   :  { %s241_s21 = scalar_lea.vmem %s24_s13, 512  ;;  %p246_p4 = scmp.lt.s32.totalorder %s24_s13, %s24_s13 }
   0xa   :  { %p242_p3 = scmp.ne.s32.totalorder %s24_s13, %s241_s21  ;;  %p247_p5 = scmp.lt.s32.totalorder %s241_s21, %s241_s21 }
   0xc   :  { %p248_p6 = por %p247_p5, %p246_p4 }
   0xe   :  { %p249_p7 = pnand %p248_p6, %p242_p3 }
  0x10   :  { %252 = shalt.err (!%p249_p7)
}
  0x11   :  { %s292_s22 = smov 128   ;;  %s293_s23 = smov 8  }
  0x12   :  { %29 = dma.hbm_to_vmem [thread:$0]  %s363_s1, 512, %s24_s13, [#allocation8], %s292_s22, %s292_s22, %s293_s23  }
  0x13   :  { %s294_s26 = smov [#allocation10]   ;;  %s253_s30 = scalar_lea.hbm %s364_s2, 512 }
  0x14   :  { %s41_s27 = sshll.u32 %s294_s26, 4  ;;  %p254_p8 = scmp.ne.s32.totalorder %s364_s2, %s253_s30  ;;  %s42_s27 = int_to_ptr.vmem [resolvable:$true] %s41_s27 }
  0x15   :  { %p257_p9 = scmp.lt.u32.totalorder %s253_s30, %s364_s2 }
  0x17   :  { %p259_p10 = pnand %p257_p9, %p254_p8 }
  0x19   :  { %262 = shalt.err (!%p259_p10)
}
  0x1a   :  { %s263_s8 = scalar_lea.vmem %s42_s27, 512  ;;  %p268_p12 = scmp.lt.s32.totalorder %s42_s27, %s42_s27 }
  0x1b   :  { %p264_p11 = scmp.ne.s32.totalorder %s42_s27, %s263_s8  ;;  %p269_p13 = scmp.lt.s32.totalorder %s263_s8, %s263_s8 }
  0x1d   :  { %p270_p0 = por %p269_p13, %p268_p12 }
  0x1f   :  { %p271_p1 = pnand %p270_p0, %p264_p11 }
  0x21   :  { %274 = shalt.err (!%p271_p1)
}
  0x22   :  { %47 = dma.hbm_to_vmem [thread:$0]  %s364_s2, 512, %s42_s27, [#allocation11], %s292_s22, %s292_s22, %s293_s23  }
  0x23   :  { %285 = dma.done.wait [#allocation8], 512  }
  0x24   :  { %286 = vsyncadd [#allocation8], 4294966784 }
  0x25   :  { %287 = dma.done.wait [#allocation11], 512  }
  0x26   :  { %288 = vsyncadd [#allocation11], 4294966784  ;;  %v295_v0 = vmov 0.0   ;;  %p217_p2 = scmp.lt.s32.totalorder %s362_s0, 32 }
  0x27   :  { %66 = vst [vmem:[#allocation2] sm:$0xff] %v295_v0  ;;  %67 = vst [vmem:[#allocation3] sm:$0xff] %v295_v0  ;;  %v77_v1 = vld [vmem:[#allocation7] sm:$0xff] (!%p217_p2)  ;;  %v78_v2 = vld [vmem:[#allocation7 + $0x8] sm:$0xff] (!%p217_p2) }
  0x28   :  { %68 = vst [vmem:[#allocation4] sm:$0xff] %v295_v0  ;;  %76 = sbr.rel (%p217_p2) target bundleno = 53 (0x35), region = 25  ;;  %v79_v3 = vld [vmem:[#allocation7 + $0x10] sm:$0xff] (!%p217_p2)  ;;  %v80_v4 = vld [vmem:[#allocation7 + $0x18] sm:$0xff] (!%p217_p2)  ;;  %v81_v5 = vld [vmem:[#allocation10] sm:$0xff] (!%p217_p2)  ;;  %v96_v7 = vadd.f32 (!%p217_p2), %v78_v2, %v77_v1 }
  0x29   :  { %v82_v6 = vld [vmem:[#allocation10 + $0x8] sm:$0xff] (!%p217_p2)  ;;  %v83_v8 = vld [vmem:[#allocation10 + $0x10] sm:$0xff] (!%p217_p2)  ;;  %v84_v9 = vld [vmem:[#allocation10 + $0x18] sm:$0xff] (!%p217_p2)  ;;  %v86_v10 = vmul.f32 (!%p217_p2), %v81_v5, %v77_v1 }
  0x2a   :  { %v87_v11 = vmul.f32 (!%p217_p2), %v82_v6, %v78_v2  ;;  %v102_v12 = vadd.f32 (!%p217_p2), %v82_v6, %v81_v5  ;;  %v88_v13 = vmul.f32 (!%p217_p2), %v83_v8, %v79_v3  ;;  %v97_v14 = vadd.f32 (!%p217_p2), %v96_v7, %v79_v3 }
  0x2b   :  { %v89_v15 = vmul.f32 (!%p217_p2), %v84_v9, %v80_v4 }
  0x2c   :  { %v90_v16 = vadd.f32 (!%p217_p2), %v87_v11, %v86_v10  ;;  %v103_v18 = vadd.f32 (!%p217_p2), %v102_v12, %v83_v8  ;;  %v98_v19 = vadd.f32 (!%p217_p2), %v97_v14, %v80_v4 }
  0x2e   :  { %v95_v17 = vld [vmem:[#allocation3] sm:$0xff] (!%p217_p2)  ;;  %v91_v21 = vadd.f32 (!%p217_p2), %v90_v16, %v88_v13  ;;  %v104_v22 = vadd.f32 (!%p217_p2), %v103_v18, %v84_v9  ;;  %v85_v23 = vld [vmem:[#allocation2] sm:$0xff] (!%p217_p2) }
  0x2f   :  { %v101_v20 = vld [vmem:[#allocation4] sm:$0xff]  ;;  %v99_v24 = vadd.f32 %v98_v19, %v95_v17 }
  0x30   :  { %v92_v25 = vadd.f32 %v91_v21, %v89_v15  ;;  %v105_v26 = vadd.f32 %v104_v22, %v101_v20 }
  0x31   :  { %100 = vst [vmem:[#allocation3] sm:$0xff] %v99_v24 }
  0x32   :  { %v93_v27 = vadd.f32 %v92_v25, %v85_v23  ;;  %106 = vst [vmem:[#allocation4] sm:$0xff] %v105_v26 }
  0x34   :  { %94 = vst [vmem:[#allocation2] sm:$0xff] %v93_v27 }
  0x35 PF:  { %p218_p3 = scmp.ge.s32.totalorder %s362_s0, 32 }
  0x36   :  { %v119_v28 = vlaneseq (!%p218_p3)  ;;  %v124_v29 = vstv (!%p218_p3), %s362_s0  ;;  %v111_v30 = vld [vmem:[#allocation7] sm:$0xff] (!%p218_p3)  ;;  %v112_v33 = vld [vmem:[#allocation7 + $0x8] sm:$0xff] (!%p218_p3)  ;;  %v113_v34 = vld [vmem:[#allocation7 + $0x10] sm:$0xff] (!%p218_p3) }
  0x37   :  { %110 = sbr.rel (%p218_p3) target bundleno = 73 (0x49), region = 29  ;;  %v115_v31 = vld [vmem:[#allocation10] sm:$0xff] (!%p218_p3)  ;;  %v114_v35 = vld [vmem:[#allocation7 + $0x18] sm:$0xff] (!%p218_p3)  ;;  %v116_v36 = vld [vmem:[#allocation10 + $0x8] sm:$0xff] (!%p218_p3) }
  0x38   :  { %v120_v32 = vshrl.u32 (!%p218_p3), %v119_v28, 7  ;;  %v117_v40 = vld [vmem:[#allocation10 + $0x10] sm:$0xff] (!%p218_p3)  ;;  %v118_v41 = vld [vmem:[#allocation10 + $0x18] sm:$0xff] (!%p218_p3) }
  0x39   :  { %v147_v58 = vld [vmem:[#allocation3] sm:$0xff] (!%p218_p3)  ;;  %v153_v62 = vld [vmem:[#allocation4] sm:$0xff] (!%p218_p3) }
  0x3a   :  { %v121_v37 = vadd.s32 (!%p218_p3), 8, %v120_v32  ;;  %v122_v38 = vadd.s32 (!%p218_p3), 16, %v120_v32  ;;  %v123_v39 = vadd.s32 (!%p218_p3), 24, %v120_v32  ;;  %vm125_vm0 = vcmp.lt.s32.totalorder (!%p218_p3), %v120_v32, %v124_v29 }
  0x3b   :  { %v129_v42 = vsel (!%p218_p3), %vm125_vm0, %v111_v30, 0.0  ;;  %v133_v43 = vsel (!%p218_p3), %vm125_vm0, %v115_v31, 0.0  ;;  %v137_v63 = vld [vmem:[#allocation2] sm:$0xff] (!%p218_p3) }
  0x3c   :  { %vm126_vm1 = vcmp.lt.s32.totalorder (!%p218_p3), %v121_v37, %v124_v29  ;;  %vm127_vm2 = vcmp.lt.s32.totalorder (!%p218_p3), %v122_v38, %v124_v29  ;;  %vm128_vm3 = vcmp.lt.s32.totalorder (!%p218_p3), %v123_v39, %v124_v29  ;;  %v138_v44 = vmul.f32 (!%p218_p3), %v133_v43, %v129_v42 }
  0x3d   :  { %v130_v45 = vsel (!%p218_p3), %vm126_vm1, %v112_v33, 0.0  ;;  %v131_v46 = vsel (!%p218_p3), %vm127_vm2, %v113_v34, 0.0  ;;  %v132_v47 = vsel (!%p218_p3), %vm128_vm3, %v114_v35, 0.0  ;;  %v134_v48 = vsel (!%p218_p3), %vm126_vm1, %v116_v36, 0.0 }
  0x3e   :  { %v135_v49 = vsel %vm127_vm2, %v117_v40, 0.0  ;;  %v136_v50 = vsel %vm128_vm3, %v118_v41, 0.0  ;;  %v139_v51 = vmul.f32 %v134_v48, %v130_v45  ;;  %v148_v52 = vadd.f32 %v130_v45, %v129_v42 }
  0x3f   :  { %v140_v53 = vmul.f32 %v135_v49, %v131_v46  ;;  %v154_v54 = vadd.f32 %v134_v48, %v133_v43  ;;  %v141_v55 = vmul.f32 %v136_v50, %v132_v47 }
  0x40   :  { %v142_v56 = vadd.f32 %v139_v51, %v138_v44  ;;  %v149_v57 = vadd.f32 %v148_v52, %v131_v46 }
  0x41   :  { %v155_v59 = vadd.f32 %v154_v54, %v135_v49 }
  0x42   :  { %v143_v60 = vadd.f32 %v142_v56, %v140_v53  ;;  %v150_v61 = vadd.f32 %v149_v57, %v132_v47 }
  0x43   :  { %v156_v0 = vadd.f32 %v155_v59, %v136_v50 }
  0x44   :  { %v144_v1 = vadd.f32 %v143_v60, %v141_v55  ;;  %v151_v2 = vadd.f32 %v150_v61, %v147_v58 }
  0x45   :  { %v157_v3 = vadd.f32 %v156_v0, %v153_v62 }
  0x46   :  { %v145_v4 = vadd.f32 %v144_v1, %v137_v63  ;;  %152 = vst [vmem:[#allocation3] sm:$0xff] %v151_v2 }
  0x47   :  { %158 = vst [vmem:[#allocation4] sm:$0xff] %v157_v3 }
  0x48   :  { %146 = vst [vmem:[#allocation2] sm:$0xff] %v145_v4 }
  0x49 PF:  { %s275_s19 = scalar_lea.hbm %s365_s3, 16 }
  0x4a   :  { %p276_p4 = scmp.ne.s32.totalorder %s365_s3, %s275_s19  ;;  %p279_p5 = scmp.lt.u32.totalorder %s275_s19, %s365_s3 }
  0x4c   :  { %p281_p6 = pnand %p279_p5, %p276_p4 }
  0x4d   :  { %v174_v7 = vld [vmem:[#allocation3] sm:$0xff] }
  0x4e   :  { %v186_v5 = vld [vmem:[#allocation4] sm:$0xff] }
  0x4f   :  { %v162_v6 = vld [vmem:[#allocation2] sm:$0xff]  ;;  %187 = vadd.xlane.f32.xlu1 %v186_v5 }
  0x50   :  { %163 = vadd.xlane.f32.xlu0 %v162_v6 }
  0x54   :  { %175 = vadd.xlane.f32.xlu0 %v174_v7 }
  0xdc   :  { %v188_v8 = vpop.xlane.xlu1 %187 }
  0xdd   :  { %v164_v9 = vpop.xlane.xlu0 %163  ;;  %v189_v10 = vrot.slane %v188_v8, 4 }
  0xde   :  { %v165_v11 = vrot.slane %v164_v9, 4 }
  0xdf   :  { %v190_v12 = vadd.f32 %v189_v10, %v188_v8 }
  0xe0   :  { %v166_v13 = vadd.f32 %v165_v11, %v164_v9 }
  0xe1   :  { %v176_v14 = vpop.xlane.xlu0 %175  ;;  %v191_v15 = vrot.slane %v190_v12, 2 }
  0xe2   :  { %v167_v16 = vrot.slane %v166_v13, 2  ;;  %v177_v17 = vrot.slane %v176_v14, 4 }
  0xe3   :  { %v192_v20 = vadd.f32 %v191_v15, %v190_v12 }
  0xe4   :  { %v178_v18 = vadd.f32 %v177_v17, %v176_v14  ;;  %v168_v19 = vadd.f32 %v167_v16, %v166_v13 }
  0xe5   :  { %v193_v25 = vrot.slane %v192_v20, 1 }
  0xe6   :  { %v179_v21 = vrot.slane %v178_v18, 2  ;;  %v169_v22 = vrot.slane %v168_v19, 1 }
  0xe7   :  { %v194_v28 = vadd.f32 %v193_v25, %v192_v20 }
  0xe8   :  { %v180_v23 = vadd.f32 %v179_v21, %v178_v18  ;;  %v170_v24 = vadd.f32 %v169_v22, %v168_v19 }
  0xea   :  { %219 = vpush %v170_v24  ;;  %v181_v26 = vrot.slane %v180_v23, 1 }
  0xec   :  { %v182_v27 = vadd.f32 %v181_v26, %v180_v23 }
  0xee   :  { %221 = vpush %v182_v27 }
  0xef   :  { %223 = vpush %v194_v28 }
 0x11b   :  { %s220_s0 = spop %219 }
 0x11c   :  { %173 = sst [smem:[#allocation12]] %s220_s0 }
 0x11f   :  { %s222_s15 = spop %221 }
 0x120   :  { %185 = sst [smem:[#allocation12 + $0x1]] %s222_s15  ;;  %s224_s16 = spop %223 }
 0x121   :  { %197 = sst [smem:[#allocation12 + $0x2]] %s224_s16 }
 0x122   :  { %284 = shalt.err (!%p281_p6)
}
 0x123   :  { %s296_s24 = smov [#allocation12]  }
 0x124   :  { %205 = dma.smem_to_hbm %s296_s24, 16, %s365_s3, [#allocation9]  }
 0x125   :  { %289 = dma.done.wait [#allocation9], 16  }
 0x126   :  { %290 = vsyncadd [#allocation9], 4294967280 }
 0x127   :  { %209 = sfence }
 0x128   :  { %210 = vsyncpa [#allocation8], 1 }
 0x129   :  { %211 = vsyncpa [#allocation11], 1 }
 0x12a   :  { %212 = vsyncpa [#allocation9], 1 }

</bundles_post_ra>
